<compile_context>
chip_gen: v5e
topology: v5e:2x2
jax: 0.10.0
libtpu: 0.0.40
codegen_flags: <defaults>
</compile_context>

<pallas_src>
import functools

import jax
import jax.numpy as jnp
import numpy as np
from jax.experimental import pallas as pl
from jax.experimental.pallas import tpu as pltpu

TEMPERATURE = 0.2
IOU_THRESHOLD = 0.5
_LABEL_PAD = -2  # never matches a real label; the queue uses -1 for "empty slot"
# NOTE: real labels are assumed >= 0 (as in detection class ids); negative real labels would
# collide with the -1 / -2 sentinels.


def _round_up(x, m):
    return ((x + m - 1) // m) * m


def _supcon_storage_kernel(feat_ref, lab_ref, keep_ref, pcnt_ref,
                           featxt_ref, labx_ref, colv_ref,
                           out_ref, m_acc, s_acc, t_acc):
    # feat_ref  : [bm, D]   row tile of features, already scaled by 1/temperature (matmul dtype)
    # lab_ref   : [bm, 1]   int32 labels of the row tile
    # keep_ref  : [bm, 1]   f32 row validity (iou >= threshold), 0 for padded rows
    # pcnt_ref  : [bm, 1]   f32 positive-pair count per row (excl. diagonal), precomputed
    # featxt_ref: [D, bk]   extended ([features; queue]) column tile, transposed (matmul dtype)
    # labx_ref  : [1, bk]   int32 labels of the extended columns
    # colv_ref  : [1, bk]   f32 column validity
    # out_ref   : [bm, 1]   per-row per_label_log_prob (0 for non-kept rows)
    bm = feat_ref.shape[0]
    bk = labx_ref.shape[1]
    i = pl.program_id(0)
    j = pl.program_id(1)
    neg_inf = jnp.float32(-jnp.inf)

    @pl.when(j == 0)
    def _():
        m_acc[...] = jnp.full_like(m_acc, -jnp.inf)
        s_acc[...] = jnp.zeros_like(s_acc)
        t_acc[...] = jnp.zeros_like(t_acc)

    # [bm, bk] similarity tile on the MXU: canonical [M,K]x[K,N] feed, f32 accumulation.
    # 1/temperature is already folded into feat_ref.
    sim = jax.lax.dot_general(
        feat_ref[...], featxt_ref[...],
        dimension_numbers=(((1,), (0,)), ((), ())),
        preferred_element_type=jnp.float32,
    )

    colv = colv_ref[...] > 0.0                                 # [1, bk]
    lab_eq = lab_ref[...] == labx_ref[...]                     # [bm, bk]

    # --- online max over valid columns (max includes the diagonal, as in torch) ---
    m_prev = m_acc[...]
    tile_max = jnp.max(jnp.where(colv, sim, neg_inf), axis=1, keepdims=True)
    m_new = jnp.maximum(m_prev, tile_max)
    m_acc[...] = m_new
    # rescale factor for the running exp-sum; guard exp(-inf - (-inf)) before any valid column
    alpha = jnp.exp(jnp.where(m_new == neg_inf, jnp.float32(0.0), m_prev - m_new))

    def _accumulate(valid_nd):
        # valid_nd: valid columns with the self-diagonal removed (broadcastable to [bm, bk])
        e = jnp.where(valid_nd, jnp.exp(sim - m_new), 0.0)
        s_acc[...] = s_acc[...] * alpha + jnp.sum(e, axis=1, keepdims=True)
        pos = valid_nd & lab_eq
        t_acc[...] += jnp.sum(jnp.where(pos, sim, 0.0), axis=1, keepdims=True)

    row_start = i * bm
    col_start = j * bk
    crosses_diag = jnp.logical_and(col_start < row_start + bm,
                                   row_start < col_start + bk)

    @pl.when(crosses_diag)
    def _():
        # only tiles intersecting the diagonal pay for the index compare
        row_ids = row_start + jax.lax.broadcasted_iota(jnp.int32, (bm, 1), 0)
        col_ids = col_start + jax.lax.broadcasted_iota(jnp.int32, (1, bk), 1)
        _accumulate(colv & (row_ids != col_ids))

    @pl.when(jnp.logical_not(crosses_diag))
    def _():
        _accumulate(colv)

    @pl.when(j == pl.num_programs(1) - 1)
    def _():
        keep = keep_ref[...] > 0.0                             # [bm, 1]
        p = pcnt_ref[...]
        s = jnp.where(keep, s_acc[...], 1.0)                   # guard log() for masked rows
        m = jnp.where(keep, m_acc[...], 0.0)
        # per_label_log_prob = (sum_pos(sim - m) - p*log(S)) / (p + 1)
        per_row = (t_acc[...] - p * (m + jnp.log(s))) / (p + 1.0)
        out_ref[...] = jnp.where(keep, per_row, 0.0)


@functools.partial(jax.jit, static_argnames=("temperature", "iou_threshold",
                                              "block_rows", "block_cols", "matmul_dtype"))
def supcon_loss_with_storage(features, labels, ious, queue, queue_label, *,
                             temperature=TEMPERATURE, iou_threshold=IOU_THRESHOLD,
                             block_rows=256, block_cols=1024,
                             matmul_dtype=jnp.bfloat16):
    """features: [N, D] f32, labels: [N] int, ious: [N] f32,
    queue: [Q, D] f32, queue_label: [Q] int  ->  scalar f32 loss."""
    assert block_rows % 8 == 0 and block_cols % 128 == 0
    n, d = features.shape
    q = queue.shape[0]
    md = matmul_dtype

    features = features.astype(jnp.float32)
    queue = queue.astype(jnp.float32)
    labels = labels.reshape(-1).astype(jnp.int32)
    queue_label = queue_label.reshape(-1).astype(jnp.int32)
    ious = ious.reshape(-1).astype(jnp.float32)

    keep_b = ious >= iou_threshold                             # [n] bool
    fg_b = queue_label != -1                                   # [q] bool

    # Positive-pair counts per row (excluding the self-diagonal), hoisted out of the kernel.
    pos_feat = jnp.sum((labels[:, None] == labels[None, :]) & keep_b[None, :], axis=1)
    pos_queue = jnp.sum((labels[:, None] == queue_label[None, :]) & fg_b[None, :], axis=1)
    pcnt = (pos_feat + pos_queue).astype(jnp.float32) - keep_b.astype(jnp.float32)  # [n]

    # Row tiling: multiple of 8; keep >=2 row tiles when possible so both v7x TensorCores
    # get work via the "parallel" row axis (harmless on single-TC v5e/v6e).
    bm = min(block_rows, _round_up(n, 8))
    if bm >= n and n > 8:
        bm = _round_up((n + 1) // 2, 8)
    n_pad = _round_up(n, bm)
    # Column tiling over the extended (features ++ queue) axis, 128-lane aligned.
    n_ext = n_pad + q
    bk = min(block_cols, _round_up(n_ext, 128))
    n_ext_pad = _round_up(n_ext, bk)

    def pad0(x, rows, value=0):
        pad = rows - x.shape[0]
        if pad == 0:
            return x
        cfg = [(0, pad)] + [(0, 0)] * (x.ndim - 1)
        return jnp.pad(x, cfg, constant_values=value)

    inv_t = jnp.float32(1.0 / float(temperature))

    # Row-side operand carries the 1/temperature scale; cast to the matmul dtype once.
    feat_rows = pad0((features * inv_t).astype(md), n_pad)                         # [n_pad, d]
    lab_col = pad0(labels, n_pad, value=_LABEL_PAD).reshape(n_pad, 1)              # [n_pad, 1]
    keep_col = pad0(keep_b.astype(jnp.float32), n_pad).reshape(n_pad, 1)           # [n_pad, 1]
    pcnt_col = pad0(pcnt, n_pad).reshape(n_pad, 1)                                 # [n_pad, 1]

    # Column-side (streamed) operand: cast BEFORE pad/concat, then lay out [D, n_ext_pad]
    # (lane-dense along the big streaming axis; canonical [K,N] MXU feed).
    feat_ext = pad0(jnp.concatenate([pad0(features.astype(md), n_pad),
                                     queue.astype(md)], axis=0), n_ext_pad)        # [n_ext_pad, d]
    feat_ext_t = feat_ext.T                                                        # [d, n_ext_pad]
    lab_ext = pad0(jnp.concatenate([pad0(labels, n_pad, value=_LABEL_PAD),
                                    queue_label], axis=0),
                   n_ext_pad, value=_LABEL_PAD).reshape(1, n_ext_pad)              # [1, n_ext_pad]
    col_valid = pad0(jnp.concatenate([pad0(keep_b.astype(jnp.float32), n_pad),
                                      fg_b.astype(jnp.float32)], axis=0),
                     n_ext_pad).reshape(1, n_ext_pad)                              # [1, n_ext_pad]

    grid = (n_pad // bm, n_ext_pad // bk)

    per_row = pl.pallas_call(
        _supcon_storage_kernel,
        out_shape=jax.ShapeDtypeStruct((n_pad, 1), jnp.float32),
        grid_spec=pltpu.PrefetchScalarGridSpec(
            num_scalar_prefetch=0,
            grid=grid,
            in_specs=[
                pl.BlockSpec((bm, d), lambda i, j: (i, 0)),   # scaled features (row tile)
                pl.BlockSpec((bm, 1), lambda i, j: (i, 0)),   # row labels
                pl.BlockSpec((bm, 1), lambda i, j: (i, 0)),   # row keep mask
                pl.BlockSpec((bm, 1), lambda i, j: (i, 0)),   # row positive-pair counts
                pl.BlockSpec((d, bk), lambda i, j: (0, j)),   # extended features^T (col tile)
                pl.BlockSpec((1, bk), lambda i, j: (0, j)),   # extended labels
                pl.BlockSpec((1, bk), lambda i, j: (0, j)),   # column validity
            ],
            out_specs=pl.BlockSpec((bm, 1), lambda i, j: (i, 0)),
            scratch_shapes=[pltpu.VMEM((bm, 1), jnp.float32)] * 3,  # m, s, t
        ),
        compiler_params=pltpu.CompilerParams(
            dimension_semantics=("parallel", "arbitrary"),
            # double-buffered bf16 tiles + f32 [bm,bk] intermediates stay well under this
            # even at bm=256, bk=1024, D~1k (also fits v7x's 64 MiB physical VMEM).
            vmem_limit_bytes=32 * 1024 * 1024,
        ),
    )(feat_rows, lab_col, keep_col, pcnt_col, feat_ext_t, lab_ext, col_valid)

    n_kept = jnp.sum(keep_b.astype(jnp.float32))
    # NaN when no rows are kept, matching torch .mean() on an empty tensor.
    return -jnp.sum(per_row) / n_kept


def supcon_loss_with_storage_ref(features, labels, ious, queue, queue_label,
                                 temperature=TEMPERATURE, iou_threshold=IOU_THRESHOLD):
    """NumPy reference mirroring the PyTorch forward exactly."""
    features = np.asarray(features, np.float32)
    labels = np.asarray(labels).reshape(-1, 1)
    ious = np.asarray(ious, np.float32)
    queue = np.asarray(queue, np.float32)
    queue_label = np.asarray(queue_label).reshape(-1)

    fg = queue_label != -1
    queue = queue[fg]
    queue_label = queue_label[fg]
    keep = ious >= iou_threshold
    feats = features[keep]
    labs = labels[keep]
    feat_ext = np.concatenate([feats, queue], axis=0)
    label_ext = np.concatenate([labs, queue_label.reshape(-1, 1)], axis=0)

    label_mask = (labs == label_ext.T).astype(np.float32)
    sim = feats @ feat_ext.T / temperature
    sim = sim - sim.max(axis=1, keepdims=True)
    logits_mask = np.ones_like(sim)
    np.fill_diagonal(logits_mask, 0.0)
    exp_sim = np.exp(sim) * logits_mask
    log_prob = sim - np.log(exp_sim.sum(axis=1, keepdims=True))
    per = (log_prob * logits_mask * label_mask).sum(1) / label_mask.sum(1)
    return -per.mean()


if __name__ == "__main__":
    key = jax.random.PRNGKey(0)
    k1, k2, k3, k4, k5, k6 = jax.random.split(key, 6)

    N, D, Q = 24, 32, 160
    features = jax.random.normal(k1, (N, D), dtype=jnp.float32)
    features = features / jnp.linalg.norm(features, axis=1, keepdims=True)
    labels = jax.random.randint(k2, (N,), 0, 5, dtype=jnp.int32)
    ious = jax.random.uniform(k3, (N,), dtype=jnp.float32, minval=0.2, maxval=1.0)
    queue = jax.random.normal(k4, (Q, D), dtype=jnp.float32)
    queue = queue / jnp.linalg.norm(queue, axis=1, keepdims=True)
    queue_label = jax.random.randint(k5, (Q,), 0, 5, dtype=jnp.int32)
    # ~25% empty storage slots, marked with -1 as in the PyTorch module
    queue_label = jnp.where(jax.random.uniform(k6, (Q,)) < 0.25, -1, queue_label)

    ref = supcon_loss_with_storage_ref(features, labels, ious, queue, queue_label)

    # f32 MXU path (exact semantics); small tiles exercise multiple row/column tiles,
    # the online accumulation and both diagonal / off-diagonal branches.
    loss_f32 = supcon_loss_with_storage(features, labels, ious, queue, queue_label,
                                        block_rows=128, block_cols=128,
                                        matmul_dtype=jnp.float32)
    loss_f32 = jax.block_until_ready(loss_f32)
    np.testing.assert_allclose(np.asarray(loss_f32), ref, rtol=1e-3, atol=1e-5)

    # bf16 MXU fast path (the default), f32 accumulation — looser tolerance.
    loss_bf16 = supcon_loss_with_storage(features, labels, ious, queue, queue_label,
                                         block_rows=128, block_cols=128)
    loss_bf16 = jax.block_until_ready(loss_bf16)
    np.testing.assert_allclose(np.asarray(loss_bf16), ref, rtol=5e-2, atol=5e-2)

    # Default (larger) tiles, bf16: single row/column tile path at this toy size.
    loss_def = supcon_loss_with_storage(features, labels, ious, queue, queue_label)
    loss_def = jax.block_until_ready(loss_def)
    np.testing.assert_allclose(np.asarray(loss_def), ref, rtol=5e-2, atol=5e-2)

    print("KERNEL_OK")
</pallas_src>

<mosaic_0001>
module attributes {stable_mosaic.version = 11 : i64} {
  func.func @_supcon_storage_kernel(%arg0: i32, %arg1: i32, %arg2: memref<16x32xf32, #tpu.memory_space<vmem>>, %arg3: memref<16x1xi32, #tpu.memory_space<vmem>>, %arg4: memref<16x1xf32, #tpu.memory_space<vmem>>, %arg5: memref<16x1xf32, #tpu.memory_space<vmem>>, %arg6: memref<32x128xf32, #tpu.memory_space<vmem>>, %arg7: memref<1x128xi32, #tpu.memory_space<vmem>>, %arg8: memref<1x128xf32, #tpu.memory_space<vmem>>, %arg9: memref<16x1xf32, #tpu.memory_space<vmem>>, %arg10: memref<16x1xf32, #tpu.memory_space<vmem>>, %arg11: memref<16x1xf32, #tpu.memory_space<vmem>>, %arg12: memref<16x1xf32, #tpu.memory_space<vmem>>) attributes {dimension_semantics = [#tpu.dimension_semantics<parallel>, #tpu.dimension_semantics<arbitrary>], iteration_bounds = array<i64: 2, 2>, scalar_prefetch = 0 : i64, scratch_operands = 3 : i64, tpu.core_type = #tpu.core_type<tc>, window_params = [{transform_indices = @transform_0, window_bounds = array<i64: 16, 32>}, {transform_indices = @transform_1, window_bounds = array<i64: 16, 1>}, {transform_indices = @transform_2, window_bounds = array<i64: 16, 1>}, {transform_indices = @transform_3, window_bounds = array<i64: 16, 1>}, {transform_indices = @transform_4, window_bounds = array<i64: 32, 128>}, {transform_indices = @transform_5, window_bounds = array<i64: 1, 128>}, {transform_indices = @transform_6, window_bounds = array<i64: 1, 128>}, {transform_indices = @transform_7, window_bounds = array<i64: 16, 1>}]} {
    %c0_i32 = arith.constant 0 : i32
    %0 = arith.cmpi eq, %arg1, %c0_i32 : i32
    %1 = arith.extui %0 : i1 to i32
    %c0_i32_0 = arith.constant 0 : i32
    %2 = arith.cmpi ne, %1, %c0_i32_0 : i32
    scf.if %2 {
      %cst_24 = arith.constant 0xFF800000 : f32
      %44 = vector.broadcast %cst_24 : f32 to vector<16x1xf32>
      %c0_25 = arith.constant 0 : index
      %c0_26 = arith.constant 0 : index
      %45 = vector.load %arg10[%c0_25, %c0_26] : memref<16x1xf32, #tpu.memory_space<vmem>>, vector<16x1xf32>
      tpu.vector_store %arg10[%c0_25, %c0_26], %44 {strides = array<i32>} : memref<16x1xf32, #tpu.memory_space<vmem>>, vector<16x1xf32>,
      %cst_27 = arith.constant 0.000000e+00 : f32
      %46 = vector.broadcast %cst_27 : f32 to vector<16x1xf32>
      %c0_28 = arith.constant 0 : index
      %c0_29 = arith.constant 0 : index
      %47 = vector.load %arg11[%c0_28, %c0_29] : memref<16x1xf32, #tpu.memory_space<vmem>>, vector<16x1xf32>
      tpu.vector_store %arg11[%c0_28, %c0_29], %46 {strides = array<i32>} : memref<16x1xf32, #tpu.memory_space<vmem>>, vector<16x1xf32>,
      %cst_30 = arith.constant 0.000000e+00 : f32
      %48 = vector.broadcast %cst_30 : f32 to vector<16x1xf32>
      %c0_31 = arith.constant 0 : index
      %c0_32 = arith.constant 0 : index
      %49 = vector.load %arg12[%c0_31, %c0_32] : memref<16x1xf32, #tpu.memory_space<vmem>>, vector<16x1xf32>
      tpu.vector_store %arg12[%c0_31, %c0_32], %48 {strides = array<i32>} : memref<16x1xf32, #tpu.memory_space<vmem>>, vector<16x1xf32>,
    } else {
    }
    %c0 = arith.constant 0 : index
    %c0_1 = arith.constant 0 : index
    %3 = vector.load %arg2[%c0, %c0_1] : memref<16x32xf32, #tpu.memory_space<vmem>>, vector<16x32xf32>
    %c0_2 = arith.constant 0 : index
    %c0_3 = arith.constant 0 : index
    %4 = vector.load %arg6[%c0_2, %c0_3] : memref<32x128xf32, #tpu.memory_space<vmem>>, vector<32x128xf32>
    %cst = arith.constant dense<0.000000e+00> : vector<16x128xf32>
    %5 = tpu.matmul %3, %4, %cst {dimension_numbers = #tpu.dot_dimension_numbers<[1], [0], [0], [1], [0, 0, 1, 1], [], []>} : vector<16x32xf32>, vector<32x128xf32>, vector<16x128xf32> -> vector<16x128xf32>
    %c0_4 = arith.constant 0 : index
    %c0_5 = arith.constant 0 : index
    %6 = vector.load %arg8[%c0_4, %c0_5] : memref<1x128xf32, #tpu.memory_space<vmem>>, vector<1x128xf32>
    %cst_6 = arith.constant 0.000000e+00 : f32
    %7 = vector.broadcast %cst_6 : f32 to vector<1x128xf32>
    %8 = arith.cmpf ogt, %6, %7 : vector<1x128xf32>
    %c0_7 = arith.constant 0 : index
    %c0_8 = arith.constant 0 : index
    %9 = vector.load %arg3[%c0_7, %c0_8] : memref<16x1xi32, #tpu.memory_space<vmem>>, vector<16x1xi32>
    %c0_9 = arith.constant 0 : index
    %c0_10 = arith.constant 0 : index
    %10 = vector.load %arg7[%c0_9, %c0_10] : memref<1x128xi32, #tpu.memory_space<vmem>>, vector<1x128xi32>
    %11 = vector.broadcast %9 : vector<16x1xi32> to vector<16x128xi32>
    %12 = vector.broadcast %10 : vector<1x128xi32> to vector<16x128xi32>
    %13 = arith.cmpi eq, %11, %12 : vector<16x128xi32>
    %c0_11 = arith.constant 0 : index
    %c0_12 = arith.constant 0 : index
    %14 = vector.load %arg10[%c0_11, %c0_12] : memref<16x1xf32, #tpu.memory_space<vmem>>, vector<16x1xf32>
    %cst_13 = arith.constant 0xFF800000 : f32
    %15 = vector.shape_cast %8 : vector<1x128xi1> to vector<1x128xi1>
    %16 = vector.broadcast %15 : vector<1x128xi1> to vector<16x128xi1>
    %17 = vector.broadcast %cst_13 : f32 to vector<16x128xf32>
    %18 = arith.select %16, %5, %17 : vector<16x128xi1>, vector<16x128xf32>
    %cst_14 = arith.constant dense<0xFF800000> : vector<16xf32>
    %19 = vector.multi_reduction <maximumf>, %18, %cst_14 [1] : vector<16x128xf32> to vector<16xf32>
    %20 = vector.shape_cast %19 : vector<16xf32> to vector<16x1xf32>
    %21 = arith.maximumf %14, %20 : vector<16x1xf32>
    %c0_15 = arith.constant 0 : index
    %c0_16 = arith.constant 0 : index
    %22 = vector.load %arg10[%c0_15, %c0_16] : memref<16x1xf32, #tpu.memory_space<vmem>>, vector<16x1xf32>
    tpu.vector_store %arg10[%c0_15, %c0_16], %21 {strides = array<i32>} : memref<16x1xf32, #tpu.memory_space<vmem>>, vector<16x1xf32>,
    %cst_17 = arith.constant 0xFF800000 : f32
    %23 = vector.broadcast %cst_17 : f32 to vector<16x1xf32>
    %24 = arith.cmpf oeq, %21, %23 : vector<16x1xf32>
    %25 = arith.subf %14, %21 : vector<16x1xf32>
    %cst_18 = arith.constant 0.000000e+00 : f32
    %26 = vector.broadcast %cst_18 : f32 to vector<16x1xf32>
    %27 = arith.select %24, %26, %25 : vector<16x1xi1>, vector<16x1xf32>
    %28 = math.exp %27 : vector<16x1xf32>
    %c16_i32 = arith.constant 16 : i32
    %29 = arith.muli %arg0, %c16_i32 : i32
    %c128_i32 = arith.constant 128 : i32
    %30 = arith.muli %arg1, %c128_i32 : i32
    %c16_i32_19 = arith.constant 16 : i32
    %31 = arith.addi %29, %c16_i32_19 : i32
    %32 = arith.cmpi slt, %30, %31 : i32
    %c128_i32_20 = arith.constant 128 : i32
    %33 = arith.addi %30, %c128_i32_20 : i32
    %34 = arith.cmpi slt, %29, %33 : i32
    %35 = arith.andi %32, %34 : i1
    %36 = arith.extui %35 : i1 to i32
    %c0_i32_21 = arith.constant 0 : i32
    %37 = arith.cmpi ne, %36, %c0_i32_21 : i32
    scf.if %37 {
      %44 = tpu.iota {dimensions = array<i32: 0>} : vector<16x1xi32>
      %45 = vector.broadcast %29 : i32 to vector<16x1xi32>
      %46 = arith.addi %45, %44 : vector<16x1xi32>
      %47 = tpu.iota {dimensions = array<i32: 1>} : vector<1x128xi32>
      %48 = vector.broadcast %30 : i32 to vector<1x128xi32>
      %49 = arith.addi %48, %47 : vector<1x128xi32>
      %50 = vector.broadcast %46 : vector<16x1xi32> to vector<16x128xi32>
      %51 = vector.broadcast %49 : vector<1x128xi32> to vector<16x128xi32>
      %52 = arith.cmpi ne, %50, %51 : vector<16x128xi32>
      %53 = vector.broadcast %8 : vector<1x128xi1> to vector<16x128xi1>
      %54 = arith.andi %53, %52 : vector<16x128xi1>
      %55 = vector.broadcast %21 : vector<16x1xf32> to vector<16x128xf32>
      %56 = arith.subf %5, %55 : vector<16x128xf32>
      %57 = math.exp %56 : vector<16x128xf32>
      %cst_24 = arith.constant 0.000000e+00 : f32
      %58 = vector.broadcast %cst_24 : f32 to vector<16x128xf32>
      %59 = arith.select %54, %57, %58 : vector<16x128xi1>, vector<16x128xf32>
      %c0_25 = arith.constant 0 : index
      %c0_26 = arith.constant 0 : index
      %60 = vector.load %arg11[%c0_25, %c0_26] : memref<16x1xf32, #tpu.memory_space<vmem>>, vector<16x1xf32>
      %61 = arith.mulf %60, %28 : vector<16x1xf32>
      %cst_27 = arith.constant dense<0.000000e+00> : vector<16xf32>
      %62 = vector.multi_reduction <add>, %59, %cst_27 [1] : vector<16x128xf32> to vector<16xf32>
      %63 = vector.shape_cast %62 : vector<16xf32> to vector<16x1xf32>
      %64 = arith.addf %61, %63 : vector<16x1xf32>
      %c0_28 = arith.constant 0 : index
      %c0_29 = arith.constant 0 : index
      %65 = vector.load %arg11[%c0_28, %c0_29] : memref<16x1xf32, #tpu.memory_space<vmem>>, vector<16x1xf32>
      tpu.vector_store %arg11[%c0_28, %c0_29], %64 {strides = array<i32>} : memref<16x1xf32, #tpu.memory_space<vmem>>, vector<16x1xf32>,
      %66 = arith.andi %54, %13 : vector<16x128xi1>
      %c0_30 = arith.constant 0 : index
      %c0_31 = arith.constant 0 : index
      %67 = vector.load %arg12[%c0_30, %c0_31] : memref<16x1xf32, #tpu.memory_space<vmem>>, vector<16x1xf32>
      %cst_32 = arith.constant 0.000000e+00 : f32
      %68 = vector.broadcast %cst_32 : f32 to vector<16x128xf32>
      %69 = arith.select %66, %5, %68 : vector<16x128xi1>, vector<16x128xf32>
      %cst_33 = arith.constant dense<0.000000e+00> : vector<16xf32>
      %70 = vector.multi_reduction <add>, %69, %cst_33 [1] : vector<16x128xf32> to vector<16xf32>
      %71 = vector.shape_cast %70 : vector<16xf32> to vector<16x1xf32>
      %72 = arith.addf %67, %71 : vector<16x1xf32>
      %c0_34 = arith.constant 0 : index
      %c0_35 = arith.constant 0 : index
      %73 = vector.load %arg12[%c0_34, %c0_35] : memref<16x1xf32, #tpu.memory_space<vmem>>, vector<16x1xf32>
      tpu.vector_store %arg12[%c0_34, %c0_35], %72 {strides = array<i32>} : memref<16x1xf32, #tpu.memory_space<vmem>>, vector<16x1xf32>,
    } else {
    }
    %true = arith.constant true
    %38 = arith.xori %35, %true : i1
    %39 = arith.extui %38 : i1 to i32
    %c0_i32_22 = arith.constant 0 : i32
    %40 = arith.cmpi ne, %39, %c0_i32_22 : i32
    scf.if %40 {
      %44 = vector.broadcast %21 : vector<16x1xf32> to vector<16x128xf32>
      %45 = arith.subf %5, %44 : vector<16x128xf32>
      %46 = math.exp %45 : vector<16x128xf32>
      %cst_24 = arith.constant 0.000000e+00 : f32
      %47 = vector.shape_cast %8 : vector<1x128xi1> to vector<1x128xi1>
      %48 = vector.broadcast %47 : vector<1x128xi1> to vector<16x128xi1>
      %49 = vector.broadcast %cst_24 : f32 to vector<16x128xf32>
      %50 = arith.select %48, %46, %49 : vector<16x128xi1>, vector<16x128xf32>
      %c0_25 = arith.constant 0 : index
      %c0_26 = arith.constant 0 : index
      %51 = vector.load %arg11[%c0_25, %c0_26] : memref<16x1xf32, #tpu.memory_space<vmem>>, vector<16x1xf32>
      %52 = arith.mulf %51, %28 : vector<16x1xf32>
      %cst_27 = arith.constant dense<0.000000e+00> : vector<16xf32>
      %53 = vector.multi_reduction <add>, %50, %cst_27 [1] : vector<16x128xf32> to vector<16xf32>
      %54 = vector.shape_cast %53 : vector<16xf32> to vector<16x1xf32>
      %55 = arith.addf %52, %54 : vector<16x1xf32>
      %c0_28 = arith.constant 0 : index
      %c0_29 = arith.constant 0 : index
      %56 = vector.load %arg11[%c0_28, %c0_29] : memref<16x1xf32, #tpu.memory_space<vmem>>, vector<16x1xf32>
      tpu.vector_store %arg11[%c0_28, %c0_29], %55 {strides = array<i32>} : memref<16x1xf32, #tpu.memory_space<vmem>>, vector<16x1xf32>,
      %57 = vector.broadcast %8 : vector<1x128xi1> to vector<16x128xi1>
      %58 = arith.andi %57, %13 : vector<16x128xi1>
      %c0_30 = arith.constant 0 : index
      %c0_31 = arith.constant 0 : index
      %59 = vector.load %arg12[%c0_30, %c0_31] : memref<16x1xf32, #tpu.memory_space<vmem>>, vector<16x1xf32>
      %cst_32 = arith.constant 0.000000e+00 : f32
      %60 = vector.broadcast %cst_32 : f32 to vector<16x128xf32>
      %61 = arith.select %58, %5, %60 : vector<16x128xi1>, vector<16x128xf32>
      %cst_33 = arith.constant dense<0.000000e+00> : vector<16xf32>
      %62 = vector.multi_reduction <add>, %61, %cst_33 [1] : vector<16x128xf32> to vector<16xf32>
      %63 = vector.shape_cast %62 : vector<16xf32> to vector<16x1xf32>
      %64 = arith.addf %59, %63 : vector<16x1xf32>
      %c0_34 = arith.constant 0 : index
      %c0_35 = arith.constant 0 : index
      %65 = vector.load %arg12[%c0_34, %c0_35] : memref<16x1xf32, #tpu.memory_space<vmem>>, vector<16x1xf32>
      tpu.vector_store %arg12[%c0_34, %c0_35], %64 {strides = array<i32>} : memref<16x1xf32, #tpu.memory_space<vmem>>, vector<16x1xf32>,
    } else {
    }
    %c1_i32 = arith.constant 1 : i32
    %41 = arith.cmpi eq, %arg1, %c1_i32 : i32
    %42 = arith.extui %41 : i1 to i32
    %c0_i32_23 = arith.constant 0 : i32
    %43 = arith.cmpi ne, %42, %c0_i32_23 : i32
    scf.if %43 {
      %c0_24 = arith.constant 0 : index
      %c0_25 = arith.constant 0 : index
      %44 = vector.load %arg4[%c0_24, %c0_25] : memref<16x1xf32, #tpu.memory_space<vmem>>, vector<16x1xf32>
      %cst_26 = arith.constant 0.000000e+00 : f32
      %45 = vector.broadcast %cst_26 : f32 to vector<16x1xf32>
      %46 = arith.cmpf ogt, %44, %45 : vector<16x1xf32>
      %c0_27 = arith.constant 0 : index
      %c0_28 = arith.constant 0 : index
      %47 = vector.load %arg5[%c0_27, %c0_28] : memref<16x1xf32, #tpu.memory_space<vmem>>, vector<16x1xf32>
      %c0_29 = arith.constant 0 : index
      %c0_30 = arith.constant 0 : index
      %48 = vector.load %arg11[%c0_29, %c0_30] : memref<16x1xf32, #tpu.memory_space<vmem>>, vector<16x1xf32>
      %cst_31 = arith.constant 1.000000e+00 : f32
      %49 = vector.broadcast %cst_31 : f32 to vector<16x1xf32>
      %50 = arith.select %46, %48, %49 : vector<16x1xi1>, vector<16x1xf32>
      %c0_32 = arith.constant 0 : index
      %c0_33 = arith.constant 0 : index
      %51 = vector.load %arg10[%c0_32, %c0_33] : memref<16x1xf32, #tpu.memory_space<vmem>>, vector<16x1xf32>
      %cst_34 = arith.constant 0.000000e+00 : f32
      %52 = vector.broadcast %cst_34 : f32 to vector<16x1xf32>
      %53 = arith.select %46, %51, %52 : vector<16x1xi1>, vector<16x1xf32>
      %c0_35 = arith.constant 0 : index
      %c0_36 = arith.constant 0 : index
      %54 = vector.load %arg12[%c0_35, %c0_36] : memref<16x1xf32, #tpu.memory_space<vmem>>, vector<16x1xf32>
      %55 = math.log %50 : vector<16x1xf32>
      %56 = arith.addf %53, %55 : vector<16x1xf32>
      %57 = arith.mulf %47, %56 : vector<16x1xf32>
      %58 = arith.subf %54, %57 : vector<16x1xf32>
      %cst_37 = arith.constant 1.000000e+00 : f32
      %59 = vector.broadcast %cst_37 : f32 to vector<16x1xf32>
      %60 = arith.addf %47, %59 : vector<16x1xf32>
      %61 = arith.divf %58, %60 : vector<16x1xf32>
      %cst_38 = arith.constant 0.000000e+00 : f32
      %62 = vector.broadcast %cst_38 : f32 to vector<16x1xf32>
      %63 = arith.select %46, %61, %62 : vector<16x1xi1>, vector<16x1xf32>
      %c0_39 = arith.constant 0 : index
      %c0_40 = arith.constant 0 : index
      %64 = vector.load %arg9[%c0_39, %c0_40] : memref<16x1xf32, #tpu.memory_space<vmem>>, vector<16x1xf32>
      tpu.vector_store %arg9[%c0_39, %c0_40], %63 {strides = array<i32>} : memref<16x1xf32, #tpu.memory_space<vmem>>, vector<16x1xf32>,
    } else {
    }
    return
  }
  func.func @transform_0(%arg0: i32, %arg1: i32) -> (i32, i32) {
    %c0_i32 = arith.constant 0 : i32
    %c0_i32_0 = arith.constant 0 : i32
    return %arg0, %c0_i32 : i32, i32
  }
  func.func @transform_1(%arg0: i32, %arg1: i32) -> (i32, i32) {
    %c0_i32 = arith.constant 0 : i32
    %c0_i32_0 = arith.constant 0 : i32
    return %arg0, %c0_i32 : i32, i32
  }
  func.func @transform_2(%arg0: i32, %arg1: i32) -> (i32, i32) {
    %c0_i32 = arith.constant 0 : i32
    %c0_i32_0 = arith.constant 0 : i32
    return %arg0, %c0_i32 : i32, i32
  }
  func.func @transform_3(%arg0: i32, %arg1: i32) -> (i32, i32) {
    %c0_i32 = arith.constant 0 : i32
    %c0_i32_0 = arith.constant 0 : i32
    return %arg0, %c0_i32 : i32, i32
  }
  func.func @transform_4(%arg0: i32, %arg1: i32) -> (i32, i32) {
    %c0_i32 = arith.constant 0 : i32
    %c0_i32_0 = arith.constant 0 : i32
    return %c0_i32, %arg1 : i32, i32
  }
  func.func @transform_5(%arg0: i32, %arg1: i32) -> (i32, i32) {
    %c0_i32 = arith.constant 0 : i32
    %c0_i32_0 = arith.constant 0 : i32
    return %c0_i32, %arg1 : i32, i32
  }
  func.func @transform_6(%arg0: i32, %arg1: i32) -> (i32, i32) {
    %c0_i32 = arith.constant 0 : i32
    %c0_i32_0 = arith.constant 0 : i32
    return %c0_i32, %arg1 : i32, i32
  }
  func.func @transform_7(%arg0: i32, %arg1: i32) -> (i32, i32) {
    %c0_i32 = arith.constant 0 : i32
    %c0_i32_0 = arith.constant 0 : i32
    return %arg0, %c0_i32 : i32, i32
  }
}

</mosaic_0001>

<bundles_post_ra>
// kernel: supcon_loss_with_storage.1
= control target key start
LH: loop header
LB: loop body
LE: loop exit
PB: predicated region body
PF: predicated region fallthrough
CT: control target
= control target key end

     0   :  { %s1368_s0 = inlined_call_operand.vmem [shape: f32[32,32], index: 0, kind: input, shape index: {}]   ;;  %s1369_s1 = inlined_call_operand.vmem [shape: s32[32,1], index: 1, kind: input, shape index: {}]   ;;  %s1370_s2 = inlined_call_operand.vmem [shape: f32[32,1], index: 2, kind: input, shape index: {}]   ;;  %s1371_s3 = inlined_call_operand.vmem [shape: f32[32,1], index: 3, kind: input, shape index: {}]   ;;  %s1372_s4 = inlined_call_operand.vmem [shape: f32[32,256], index: 4, kind: input, shape index: {}]   ;;  %s1373_s5 = inlined_call_operand.vmem [shape: s32[1,256], index: 5, kind: input, shape index: {}]   ;;  %s1374_s6 = inlined_call_operand.vmem [shape: f32[1,256], index: 6, kind: input, shape index: {}]   ;;  %s1375_s7 = inlined_call_operand.vmem [shape: f32[32,1], index: 7, kind: output, shape index: {}]  }
   0x1   :  { %1378 = sst [smem:[#allocation9_spill]] %s1368_s0 }
   0x2   :  { %1379 = sst [smem:[#allocation10_spill]] %s1369_s1 }
   0x3   :  { %1380 = sst [smem:[#allocation11_spill]] %s1372_s4 }
   0x4   :  { %s1080_s24 = smov 0   ;;  %s1082_s25 = smov 0  }
   0x5   :  { %s1084_s26 = smov 0   ;;  %s1086_s27 = smov 0  }
   0x6   :  { %s1088_s28 = smov 0   ;;  %s1090_s29 = smov 0  }
   0x7   :  { %s1092_s30 = smov 0  }
   0x8 LB: > { %1381 = sst [smem:[#allocation6_spill]] %s1029_s29  ;;  %s26_s8 = sadd.s32 1, %s1025_s28  ;;  %s1033_s30 = sphi %s1092_s30, %s17_s30   ;;  %s1029_s29 = sphi %s1090_s29, %s1397_s29   ;;  %s1025_s28 = sphi %s1088_s28, %s1401_s28   ;;  %s1021_s27 = sphi %s1086_s27, %s1395_s27   ;;  %s1017_s26 = sphi %s1084_s26, %s1400_s26   ;;  %s1013_s25 = sphi %s1082_s25, %s1399_s25   ;;  %s1009_s24 = sphi %s1080_s24, %s1398_s24  }
   0x9   : > { %s29_s9 = sadd.s32 1, %s1029_s29  ;;  %p27_p0 = scmp.ge.s32.totalorder %s26_s8, 2 }
   0xa   : > { %s140_s10 = sadd.s32 1, %s1013_s25  ;;  %p147_p1 = scmp.ne.s32.totalorder %s1013_s25, %s1009_s24 }
   0xb   : > { %p148_p2 = scmp.eq.s32.totalorder %s1033_s30, 0  ;;  %s1403_s8 = smov (%p27_p0, %s26_s8), 0 }
   0xc   : > { %1382 = sst [smem:[#allocation7_spill]] %s1403_s8  ;;  %s1405_s9 = smov (!%p27_p0, %s29_s9), %s1029_s29 }
   0xd   : > { %s137_s11 = ssub.s32 %s1025_s28, %s1403_s8  ;;  %p149_p3 = por %p148_p2, %p147_p1 }
   0xe   : > { %p31_p4 = scmp.ge.s32.totalorder %s1405_s9, 2  ;;  %p138_p5 = scmp.eq.s32.totalorder %s137_s11, 0 }
   0xf   : > { %p866_p6 = scmp.ge.s32.totalorder %s1033_s30, 4 }
  0x10   : > { %s1407_s9 = smov (%p31_p4, %s1405_s9), 0 }
  0x11   : > { %1383 = sst [smem:[#allocation8_spill]] %s1407_s9  ;;  %251 = sbr.rel (%p866_p6) target bundleno = 36 (0x24), region = 16 }
  0x12   : > { %s1129_s12 = scalar_select %p138_p5, %s1013_s25, %s140_s10  }
  0x16   : > { %290 = sbr.rel (!%p149_p3) target bundleno = 36 (0x24), region = 36  ;;  %s292_s13 = sand.u32 (%p149_p3), 1, %s1013_s25  }
  0x17   : > { %s868_s14 = sshll.u32 (%p149_p3), %s1025_s28, 3  ;;  %s867_s15 = sshll.u32 (%p149_p3), %s292_s13, 5 }
  0x18   : > { %s1384_s4 = sld [smem:[#allocation11_spill]] (%p149_p3)  ;;  %s294_s19 = scalar_lea.vmem (%p149_p3), [#allocation5], %s867_s15 }
  0x1e   : > { %s296_s18 = scalar_lea.vmem %s1384_s4, %s868_s14 }
  0x1f   : > { %v331_v0 = vld [vmem:[%s296_s18] sm:$0xff]  ;;  %v333_v1 = vld [vmem:[%s296_s18 + $0x10] sm:$0xff] }
  0x20   : > { %v335_v2 = vld [vmem:[%s296_s18 + $0x20] sm:$0xff]  ;;  %332 = vst [vmem:[%s294_s19] sm:$0xff] %v331_v0  ;;  %v337_v3 = vld [vmem:[%s296_s18 + $0x30] sm:$0xff] }
  0x21   : > { %334 = vst [vmem:[%s294_s19 + $0x8] sm:$0xff] %v333_v1 }
  0x22   : > { %336 = vst [vmem:[%s294_s19 + $0x10] sm:$0xff] %v335_v2 }
  0x23   : > { %338 = vst [vmem:[%s294_s19 + $0x18] sm:$0xff] %v337_v3 }
  0x24 PF: > { %p869_p7 = scmp.ge.s32.totalorder %s1033_s30, 1  ;;  %p355_p8 = scmp.lt.s32.totalorder %s1033_s30, 5 }
  0x26   : > { %p356_p9 = pnand %p869_p7, %p355_p8 }
  0x27   : > { %s362_s20 = sand.u32 (!%p356_p9), 1, %s1009_s24   ;;  %s871_s21 = sshll.u32 (!%p356_p9), %s1021_s27, 1 }
  0x28   : > { %359 = sbr.rel (%p356_p9) target bundleno = 878 (0x36e), region = 82  ;;  %s870_s22 = sshll.u32 (!%p356_p9), %s362_s20, 5 }
  0x29   : > { %p420_p10 = scmp.lt.s32.totalorder (!%p356_p9), %s871_s21, 3  ;;  %p443_p11 = scmp.lt.s32.totalorder (!%p356_p9), %s1017_s26, 1 }
  0x2a   : > { %s1385_s0 = sld [smem:[#allocation9_spill]] (!%p356_p9)  ;;  %s364_s24 = scalar_lea.vmem (!%p356_p9), [#allocation5], %s870_s22 }
  0x2b   : > { %s1386_s1 = sld [smem:[#allocation10_spill]] (!%p356_p9)  ;;  %p881_p12 = scmp.ne.s32.totalorder (!%p356_p9), %s1017_s26, 0 }
  0x2d   : > { %s1409_s21 = smov (!%p420_p10, %s871_s21), 3 }
  0x2e   : > { %s1143_s23 = scalar_select %p443_p11, %s1017_s26, 1 }
  0x2f   : > { %s872_s10 = sshll.u32 %s1409_s21, 3  ;;  %458 = sbr.rel (%p881_p12) target bundleno = 59 (0x3b), region = 90 }
  0x30   : > { %s1148_s14 = scalar_lea.vmem %s1385_s0, %s872_s10  ;;  %s1158_s19 = scalar_lea.vmem %s1370_s2, %s872_s10 }
  0x31   : > { %s1153_s17 = scalar_lea.vmem %s1386_s1, %s872_s10  ;;  %s1163_s9 = scalar_lea.vmem %s1371_s3, %s872_s10 }
  0x32   : > { %s445_s11 = scalar_lea.vmem %s1373_s5, %s1143_s23  ;;  %s448_s15 = scalar_lea.vmem %s1374_s6, %s1143_s23 }
  0x33   : > { %s1176_s29 = scalar_lea.vmem %s1375_s7, %s872_s10 }
  0x34   : > { %vm459_vm0 = vcmask 7168   ;;  %v1035_v4 = vmov -inf   ;;  %v1036_v5 = vmov 0.0  }
  0x35   : > { %460 = vst.msk [vmem:[#allocation2] sm:$0xff] %vm459_vm0, %v1035_v4 }
  0x36   : > { %461 = vst.msk [vmem:[#allocation2 + $0x8] sm:$0xff] %vm459_vm0, %v1035_v4 }
  0x37   : > { %462 = vst.msk [vmem:[#allocation3] sm:$0xff] %vm459_vm0, %v1036_v5 }
  0x38   : > { %463 = vst.msk [vmem:[#allocation3 + $0x8] sm:$0xff] %vm459_vm0, %v1036_v5 }
  0x39   : > { %464 = vst.msk [vmem:[#allocation4] sm:$0xff] %vm459_vm0, %v1036_v5 }
  0x3a   : > { %465 = vst.msk [vmem:[#allocation4 + $0x8] sm:$0xff] %vm459_vm0, %v1036_v5 }
  0x3b PF: > { %v471_v6 = vld [vmem:[%s364_s24 + $0x18] sm:$0xff]  ;;  %v470_v7 = vld [vmem:[%s364_s24 + $0x10] sm:$0xff]  ;;  %v469_v8 = vld [vmem:[%s364_s24 + $0x8] sm:$0xff]  ;;  %vm472_vm1 = vcmask 261120   ;;  %v1037_v12 = vmov 0   ;;  %s1198_s4 = sshll.u32 %s1021_s27, 4 }
  0x3c   : > { %491 = vmatpush.msra.mxu0 %v471_v6  ;;  %889 = vmatpush.msra.mxu1 %v471_v6  ;;  %v468_v9 = vld [vmem:[%s364_s24] sm:$0xff]  ;;  %v466_v10 = vld [vmem:[%s1148_s14] sm:$0xff]  ;;  %v467_v11 = vld [vmem:[%s1148_s14 + $0x8] sm:$0xff]  ;;  %s1201_s8 = sshll.u32 %s1017_s26, 7  ;;  %s544_s22 = sadd.s32 16, %s1198_s4  ;;  %vm529_vm6 = vcmask 7168  }
  0x3d   : > { %954 = vset.pattern.permute.xlu1 %v1037_v12  ;;  %955 = vset.pattern.permute.xlu0 %v1037_v12  ;;  %v504_v13 = vld [vmem:[%s1153_s17] sm:$0xff]  ;;  %v505_v14 = vld [vmem:[%s1153_s17 + $0x8] sm:$0xff]  ;;  %s546_s10 = sadd.s32 128, %s1201_s8  ;;  %p1206_p13 = scmp.lt.s32.totalorder %s1201_s8, %s544_s22 }
  0x3e   : > { %492 = vmatpush.msra.mxu0 %v470_v7  ;;  %890 = vmatpush.msra.mxu1 %v470_v7  ;;  %v502_v15 = vld [vmem:[%s448_s15] sm:$0x1]  ;;  %p1211_p0 = scmp.lt.s32.totalorder %s1198_s4, %s546_s10  ;;  %v517_v32 = vld [vmem:[#allocation2 + $0x8] sm:$0xff] }
  0x3f   : > { %508 = vperm.xlu1 %954, %v504_v13   ;;  %vm503_vm2 = vcmp.gt.f32.partialorder %v502_v15, 0.0  ;;  %v1229_v23 = vld [vmem:[%s445_s11] ss:$0 sm:$0xff] }
  0x40   : > { %493 = vmatpush.msra.mxu0 %v469_v8  ;;  %891 = vmatpush.msra.mxu1 %v469_v8  ;;  %v518_v16 = vsel %vm503_vm2, 1, %v1037_v12  ;;  %p548_p1 = pnand %p1211_p0, %p1206_p13  ;;  %v516_v26 = vld [vmem:[#allocation2] sm:$0xff] }
  0x41   : > { %v519_v17 = vperm.slane %v518_v16, 0 }
  0x42   : > { %494 = vmatpush.msra.mxu0 %v468_v9  ;;  %892 = vmatpush.msra.mxu1 %v468_v9 }
  0x43   : > { %882 = vmatmul.msk.f32.vlgmr.msra.gmra.mxu0 %vm472_vm1, %v466_v10  ;;  %883 = vmatmul.msk.f32.vlgmr.msra.gmra.mxu1 %vm472_vm1, %v467_v11  ;;  %vm1188_vm3 = vcmp.eq.s32.totalorder %v519_v17, 1 }
  0x47   : > { %511 = vperm.xlu1 %954, %v505_v14  }
  0xb1   : > { %v1231_v24 = vpop.permute.xlu1 %508 }
  0xb2   : > { %vm514_vm4 = vcmp.eq.s32.totalorder %v1231_v24, %v1229_v23 }
  0xb9   : > { %v1235_v25 = vpop.permute.xlu1 %511 }
  0xba   : > { %vm515_vm5 = vcmp.eq.s32.totalorder %v1235_v25, %v1229_v23 }
  0xc0   : > { %v1192_v19 = vpop.f32.mrf.mxu0  ;;  %v1215_v21 = vpop.f32.mrf.mxu1 }
  0xc1   : > { %v521_v20 = vsel %vm1188_vm3, %v1192_v19, -inf  ;;  %v522_v22 = vsel %vm1188_vm3, %v1215_v21, -inf }
  0xc2   : > { %523 = vmax.xlane.f32.xlu0 %v521_v20 }
  0xca   : > { %525 = vmax.xlane.f32.xlu0 %v522_v22 }
 0x135   : > { %v524_v27 = vpop.xlane.xlu0 %523 }
 0x136   : > { %v1239_v28 = vmax.f32 %v516_v26, %v524_v27 }
 0x138   : > { %530 = vst.msk [vmem:[#allocation2] sm:$0xff] %vm529_vm6, %v1239_v28  ;;  %vm532_vm7 = vcmp.eq.f32.partialorder %v1239_v28, -inf  ;;  %v534_v29 = vsub.f32 %v516_v26, %v1239_v28 }
 0x13a   : > { %v536_v30 = vsel %vm532_vm7, 0.0, %v534_v29 }
 0x13b   : > { %v538_v31 = vmul.f32 1.442695, %v536_v30 }
 0x13d   : > { %957 = vpow2.f32 %v538_v31  ;;  %v526_v33 = vpop.xlane.xlu0 %525 }
 0x13e   : > { %v1245_v34 = vmax.f32 %v517_v32, %v526_v33 }
 0x140   : > { %531 = vst.msk [vmem:[#allocation2 + $0x8] sm:$0xff] %vm529_vm6, %v1245_v34  ;;  %vm533_vm8 = vcmp.eq.f32.partialorder %v1245_v34, -inf  ;;  %v535_v35 = vsub.f32 %v517_v32, %v1245_v34 }
 0x142   : > { %v537_v36 = vsel %vm533_vm8, 0.0, %v535_v35 }
 0x143   : > { %v1251_v37 = vpop.eup %957  ;;  %v540_v38 = vmul.f32 1.442695, %v537_v36 }
 0x145   : > { %959 = vpow2.f32 %v540_v38 }
 0x147   : > { %551 = sbr.rel (%p548_p1) target bundleno = 588 (0x24c), region = 94 }
 0x14b   : > { %v1253_v39 = vpop.eup %959 }
 0x14c   : > { %v1038_v40 = vmov 0   ;;  %v552_v41 = vlaneseq  ;;  %v555_v44 = vstv %s1198_s4  ;;  %v560_v45 = vstv %s1201_s8  ;;  %v598_v0 = vld [vmem:[#allocation4] sm:$0xff]  ;;  %v599_v3 = vld [vmem:[#allocation4 + $0x8] sm:$0xff]  ;;  %v584_v6 = vld [vmem:[#allocation3] sm:$0xff] }
 0x14d   : > { %961 = vset.pattern.permute.xlu0 %v1038_v40  ;;  %v586_v7 = vmul.f32 %v1251_v37, %v584_v6  ;;  %v585_v10 = vld [vmem:[#allocation3 + $0x8] sm:$0xff] }
 0x14e   : > { %568 = vperm.xlu0 %961, %v1239_v28   ;;  %v553_v42 = vshrl.u32 %v552_v41, 7  ;;  %v559_v43 = vand.u32 127, %v552_v41  ;;  %v587_v11 = vmul.f32 %v1253_v39, %v585_v10 }
 0x150   : > { %v556_v46 = vadd.s32 %v555_v44, %v553_v42  ;;  %v561_v47 = vadd.s32 %v560_v45, %v559_v43  ;;  %v554_v50 = vadd.s32 8, %v553_v42 }
 0x152   : > { %vm562_vm9 = vcmp.ne.s32.totalorder %v556_v46, %v561_v47  ;;  %v557_v51 = vadd.s32 %v555_v44, %v554_v50 }
 0x153   : > { %vm1266_vm10 = vmand %vm1188_vm3, %vm562_vm9 }
 0x154   : > { %vm596_vm11 = vmand %vm1266_vm10, %vm514_vm4  ;;  %vm563_vm12 = vcmp.ne.s32.totalorder %v557_v51, %v561_v47 }
 0x155   : > { %v600_v49 = vsel %vm596_vm11, %v1192_v19, 0.0  ;;  %vm1278_vm13 = vmand %vm1188_vm3, %vm563_vm12 }
 0x156   : > { %573 = vperm.xlu0 %961, %v1245_v34   ;;  %602 = vadd.xlane.f32.xlu2 %v600_v49  ;;  %vm597_vm14 = vmand %vm1278_vm13, %vm515_vm5 }
 0x157   : > { %v601_v53 = vsel %vm597_vm14, %v1215_v21, 0.0 }
 0x15e   : > { %604 = vadd.xlane.f32.xlu2 %v601_v53 }
 0x1c0   : > { %v569_v54 = vpop.permute.xlu0 %568 }
 0x1c1   : > { %v576_v55 = vsub.f32 %v1192_v19, %v569_v54 }
 0x1c3   : > { %v578_v56 = vmul.f32 1.442695, %v576_v55 }
 0x1c5   : > { %962 = vpow2.f32 %v578_v56 }
 0x1c8   : > { %v574_v57 = vpop.permute.xlu0 %573 }
 0x1c9   : > { %v577_v58 = vsub.f32 %v1215_v21, %v574_v57  ;;  %v603_v1 = vpop.xlane.xlu2 %602 }
 0x1ca   : > { %v606_v2 = vadd.f32 %v603_v1, %v598_v0 }
 0x1cb   : > { %v963_v59 = vpop.eup %962  ;;  %v580_v60 = vmul.f32 1.442695, %v577_v58 }
 0x1cc   : > { %v582_v61 = vsel %vm1266_vm10, %v963_v59, 0.0  ;;  %608 = vst.msk [vmem:[#allocation4] sm:$0xff] %vm529_vm6, %v606_v2 }
 0x1cd   : > { %964 = vpow2.f32 %v580_v60  ;;  %588 = vadd.xlane.f32.xlu1 %v582_v61 }
 0x1d1   : > { %v605_v4 = vpop.xlane.xlu2 %604 }
 0x1d2   : > { %v607_v5 = vadd.f32 %v605_v4, %v599_v3 }
 0x1d3   : > { %v965_v62 = vpop.eup %964 }
 0x1d4   : > { %v583_v63 = vsel %vm1278_vm13, %v965_v62, 0.0  ;;  %609 = vst.msk [vmem:[#allocation4 + $0x8] sm:$0xff] %vm529_vm6, %v607_v5 }
 0x1d5   : > { %590 = vadd.xlane.f32.xlu1 %v583_v63 }
 0x240   : > { %v589_v8 = vpop.xlane.xlu1 %588 }
 0x241   : > { %v592_v9 = vadd.f32 %v589_v8, %v586_v7 }
 0x243   : > { %594 = vst.msk [vmem:[#allocation3] sm:$0xff] %vm529_vm6, %v592_v9 }
 0x248   : > { %v591_v12 = vpop.xlane.xlu1 %590 }
 0x249   : > { %v593_v13 = vadd.f32 %v591_v12, %v587_v11 }
 0x24b   : > { %595 = vst.msk [vmem:[#allocation3 + $0x8] sm:$0xff] %vm529_vm6, %v593_v13 }
 0x24c PF: > { %612 = sbr.rel (!%p548_p1) target bundleno = 844 (0x34c), region = 98  ;;  %v1039_v14 = vmov (%p548_p1), 0   ;;  %vm643_vm15 = vmand (%p548_p1), %vm1188_vm3, %vm514_vm4  ;;  %v645_v30 = vld [vmem:[#allocation4] sm:$0xff] (%p548_p1)  ;;  %v646_v32 = vld [vmem:[#allocation4 + $0x8] sm:$0xff] (%p548_p1) }
 0x24d   : > { %966 = vset.pattern.permute.xlu0 (%p548_p1), %v1039_v14  ;;  %v647_v15 = vsel (%p548_p1), %vm643_vm15, %v1192_v19, 0.0  ;;  %vm644_vm0 = vmand (%p548_p1), %vm1188_vm3, %vm515_vm5 }
 0x24e   : > { %615 = vperm.xlu0 (%p548_p1), %966, %v1239_v28   ;;  %649 = vadd.xlane.f32.xlu2 (%p548_p1), %v647_v15  ;;  %v648_v16 = vsel (%p548_p1), %vm644_vm0, %v1215_v21, 0.0 }
 0x252   : > { %v632_v40 = vld [vmem:[#allocation3 + $0x8] sm:$0xff] }
 0x253   : > { %v634_v18 = vmul.f32 %v1253_v39, %v632_v40 }
 0x256   : > { %620 = vperm.xlu0 %966, %v1245_v34   ;;  %651 = vadd.xlane.f32.xlu2 %v648_v16  ;;  %v631_v34 = vld [vmem:[#allocation3] sm:$0xff] }
 0x257   : > { %v633_v35 = vmul.f32 %v1251_v37, %v631_v34 }
 0x2c0   : > { %v616_v17 = vpop.permute.xlu0 %615 }
 0x2c1   : > { %v623_v20 = vsub.f32 %v1192_v19, %v616_v17  ;;  %v650_v31 = vpop.xlane.xlu2 %649 }
 0x2c2   : > { %v653_v19 = vadd.f32 %v650_v31, %v645_v30 }
 0x2c3   : > { %v625_v22 = vmul.f32 1.442695, %v623_v20 }
 0x2c4   : > { %655 = vst.msk [vmem:[#allocation4] sm:$0xff] %vm529_vm6, %v653_v19 }
 0x2c5   : > { %967 = vpow2.f32 %v625_v22 }
 0x2c8   : > { %v621_v24 = vpop.permute.xlu0 %620 }
 0x2c9   : > { %v624_v26 = vsub.f32 %v1215_v21, %v621_v24  ;;  %v652_v33 = vpop.xlane.xlu2 %651 }
 0x2ca   : > { %v654_v21 = vadd.f32 %v652_v33, %v646_v32 }
 0x2cb   : > { %v968_v27 = vpop.eup %967  ;;  %v627_v28 = vmul.f32 1.442695, %v624_v26 }
 0x2cc   : > { %v629_v29 = vsel %vm1188_vm3, %v968_v27, 0.0  ;;  %656 = vst.msk [vmem:[#allocation4 + $0x8] sm:$0xff] %vm529_vm6, %v654_v21 }
 0x2cd   : > { %969 = vpow2.f32 %v627_v28  ;;  %635 = vadd.xlane.f32.xlu1 %v629_v29 }
 0x2d3   : > { %v970_v23 = vpop.eup %969 }
 0x2d4   : > { %v630_v25 = vsel %vm1188_vm3, %v970_v23, 0.0 }
 0x2d5   : > { %637 = vadd.xlane.f32.xlu1 %v630_v25 }
 0x340   : > { %v636_v36 = vpop.xlane.xlu1 %635 }
 0x341   : > { %v639_v38 = vadd.f32 %v636_v36, %v633_v35 }
 0x343   : > { %641 = vst.msk [vmem:[#allocation3] sm:$0xff] %vm529_vm6, %v639_v38 }
 0x348   : > { %v638_v41 = vpop.xlane.xlu1 %637 }
 0x349   : > { %v640_v42 = vadd.f32 %v638_v41, %v634_v18 }
 0x34b   : > { %642 = vst.msk [vmem:[#allocation3 + $0x8] sm:$0xff] %vm529_vm6, %v640_v42 }
 0x34c PF: > { %p886_p2 = scmp.ne.s32.totalorder %s1017_s26, 1 }
 0x34e   : > { %660 = sbr.rel (%p886_p2) target bundleno = 878 (0x36e), region = 102 }
 0x353   : > { %v661_v37 = vld [vmem:[%s1158_s19] sm:$0xff]  ;;  %v667_v44 = vld [vmem:[#allocation3] sm:$0xff]  ;;  %v662_v46 = vld [vmem:[%s1158_s19 + $0x8] sm:$0xff] }
 0x354   : > { %v665_v43 = vld [vmem:[%s1163_s9] sm:$0xff]  ;;  %vm663_vm1 = vcmp.gt.f32.partialorder %v661_v37, 0.0  ;;  %vm664_vm2 = vcmp.gt.f32.partialorder %v662_v46, 0.0  ;;  %v666_v47 = vld [vmem:[%s1163_s9 + $0x8] sm:$0xff]  ;;  %v668_v48 = vld [vmem:[#allocation3 + $0x8] sm:$0xff] }
 0x355   : > { %v687_v45 = vadd.f32 1.0, %v665_v43  ;;  %v669_v39 = vsel %vm663_vm1, %v667_v44, 1.0  ;;  %v670_v49 = vsel %vm664_vm2, %v668_v48, 1.0  ;;  %v688_v50 = vadd.f32 1.0, %v666_v47  ;;  %v671_v51 = vld [vmem:[#allocation2] sm:$0xff]  ;;  %v672_v52 = vld [vmem:[#allocation2 + $0x8] sm:$0xff] }
 0x356   : > { %971 = vlog2.f32 %v669_v39  ;;  %v673_v54 = vsel %vm663_vm1, %v671_v51, 0.0  ;;  %v674_v59 = vsel %vm664_vm2, %v672_v52, 0.0  ;;  %v675_v3 = vld [vmem:[#allocation4] sm:$0xff]  ;;  %v676_v11 = vld [vmem:[#allocation4 + $0x8] sm:$0xff] }
 0x357   : > { %973 = vrcp.f32 %v687_v45  ;;  %vm694_vm3 = vweird.f32 %v687_v45  ;;  %v700_v62 = vand.u32 2147483648, %v687_v45  ;;  %v698_v1 = vand.u32 2147483647, %v687_v45 }
 0x358   : > { %975 = vlog2.f32 %v670_v49  ;;  %vm709_vm5 = vweird.f32 %v688_v50  ;;  %v715_v6 = vand.u32 2147483648, %v688_v50  ;;  %v713_v9 = vand.u32 2147483647, %v688_v50 }
 0x359   : > { %977 = vrcp.f32 %v688_v50  ;;  %v701_v10 = vor.u32 1.1754944e-38, %v700_v62  ;;  %vm699_vm9 = vcmp.eq.f32.partialorder %v698_v1, 8.507059e+37 }
 0x35a   : > { %v716_v16 = vor.u32 1.1754944e-38, %v715_v6  ;;  %vm714_vm11 = vcmp.eq.f32.partialorder %v713_v9, 8.507059e+37 }
 0x35c   : > { %v972_v53 = vpop.eup %971 }
 0x35d   : > { %v974_v55 = vpop.eup %973  ;;  %v678_v56 = vmul.f32 0.6931472, %v972_v53 }
 0x35e   : > { %v976_v57 = vpop.eup %975  ;;  %v690_v58 = vmul.f32 %v974_v55, %v687_v45  ;;  %vm695_vm4 = vweird.f32 %v974_v55 }
 0x35f   : > { %v978_v60 = vpop.eup %977  ;;  %v681_v61 = vadd.f32 %v678_v56, %v673_v54  ;;  %v680_v63 = vmul.f32 0.6931472, %v976_v57  ;;  %vm696_vm8 = vmor %vm694_vm3, %vm695_vm4 }
 0x360   : > { %v691_v0 = vsub.f32 1.0, %v690_v58  ;;  %v705_v2 = vmul.f32 %v978_v60, %v688_v50  ;;  %vm710_vm7 = vweird.f32 %v978_v60 }
 0x361   : > { %v683_v4 = vmul.f32 %v681_v61, %v665_v43  ;;  %v682_v5 = vadd.f32 %v680_v63, %v674_v59  ;;  %vm711_vm10 = vmor %vm709_vm5, %vm710_vm7 }
 0x362   : > { %v692_v7 = vmul.f32 %v974_v55, %v691_v0  ;;  %v706_v8 = vsub.f32 1.0, %v705_v2 }
 0x363   : > { %v684_v12 = vmul.f32 %v682_v5, %v666_v47  ;;  %v685_v13 = vsub.f32 %v675_v3, %v683_v4 }
 0x364   : > { %v693_v14 = vadd.f32 %v974_v55, %v692_v7  ;;  %v707_v15 = vmul.f32 %v978_v60, %v706_v8 }
 0x365   : > { %v686_v20 = vsub.f32 %v676_v11, %v684_v12 }
 0x366   : > { %v697_v17 = vsel %vm696_vm8, %v974_v55, %v693_v14  ;;  %v708_v22 = vadd.f32 %v978_v60, %v707_v15 }
 0x367   : > { %v702_v24 = vsel %vm699_vm9, %v701_v10, %v697_v17 }
 0x368   : > { %v703_v26 = vmul.f32 %v702_v24, %v685_v13  ;;  %v712_v27 = vsel %vm711_vm10, %v978_v60, %v708_v22 }
 0x369   : > { %v717_v28 = vsel %vm714_vm11, %v716_v16, %v712_v27 }
 0x36a   : > { %v719_v29 = vsel %vm663_vm1, %v703_v26, 0.0  ;;  %v718_v23 = vmul.f32 %v717_v28, %v686_v20 }
 0x36b   : > { %721 = vst.msk [vmem:[%s1176_s29] sm:$0xff] %vm529_vm6, %v719_v29 }
 0x36c   : > { %v720_v25 = vsel %vm664_vm2, %v718_v23, 0.0 }
 0x36d   : > { %722 = vst.msk [vmem:[%s1176_s29 + $0x8] sm:$0xff] %vm529_vm6, %v720_v25 }
 0x36e PF: > { %s17_s30 = sadd.s32 1, %s1033_s30   ;;  %s1395_s27 = sld [smem:[#allocation6_spill]] }
 0x36f   : > { %p14_p3 = scmp.ge.s32.totalorder %s17_s30, 6   ;;  %s1396_s9 = sld [smem:[#allocation7_spill]] }
 0x370   : > { %s1397_s29 = sld [smem:[#allocation8_spill]]  ;;  %s1398_s24 = smov %s1013_s25 }
 0x371   : > { %s1399_s25 = smov %s1129_s12  ;;  %s1400_s26 = smov %s1025_s28 }
 0x372   :  { %16 = sbr.rel (!%p14_p3) target bundleno = 8 (0x8), region = 155 }
 0x375   : > { %s1401_s28 = smov %s1396_s9 }

</bundles_post_ra>
